<compile_context>
chip_gen: v5e
topology: v5e:2x2
jax: 0.10.0
libtpu: 0.0.40
codegen_flags: <defaults>
</compile_context>

<pallas_src>
import jax
import jax.numpy as jnp
from jax.experimental import pallas as pl
from jax.experimental.pallas import tpu as pltpu

Align_Corners_Range = False


# ======================= VMEM budgeting / tiling =======================

def _tpu_vmem_capacity():
    try:
        cap = int(pltpu.get_tpu_info().vmem_capacity_bytes)
        if cap > 0:
            return cap
    except Exception:
        pass
    return 64 << 20          # conservative (v7x-sized) fallback


_VMEM_CAP = _tpu_vmem_capacity()
# 96 MiB scoped limit on v5e/v6e (128 MiB physical), 48 MiB on v7x (64 MiB).
_VMEM_LIMIT = int(min(3 * _VMEM_CAP // 4, 96 << 20))
_TILE_BUDGET = _VMEM_LIMIT // 2      # headroom for compiler scratch


def _pad_rows(n, dtype_bytes):
    """Rows after sublane padding for a VMEM tile whose 2nd-minor dim is n."""
    sub = 8 * (4 // dtype_bytes)     # 8 for f32, 16 for bf16
    return ((n + sub - 1) // sub) * sub


def _pick_tile(L, per_lane_bytes, *, budget_bytes=None, max_tile=8192, min_tiles=1):
    """Largest lane tile (multiple of 128, preferring one that divides L) whose
    working set (per_lane_bytes already includes double-buffering, sublane
    padding and in-kernel f32 temporaries) fits the VMEM budget, while
    exposing at least `min_tiles` lane-axis grid steps (v7x megacore)."""
    if budget_bytes is None:
        budget_bytes = _TILE_BUDGET
    if L <= 128:
        return L
    cap = min(max_tile, L, max(128, budget_bytes // max(per_lane_bytes, 1)))
    if min_tiles > 1:
        cap = min(cap, max(128, -(-L // min_tiles)))
    cap = max(128, (cap // 128) * 128)
    t = cap
    while t >= 128:
        if L % t == 0:
            return t
        t -= 128
    # No 128-multiple divides L: accept a partial edge block. All in-kernel
    # reductions are over sublanes only, so padded lanes never contaminate
    # valid outputs (and OOB output lanes are not written back).
    return cap


# ============================ Pallas kernels ============================

def fused_variance_cost_pallas(ref_feat, src_vols, wb, out_dtype=jnp.bfloat16):
    """Fused multi-view variance + 1x1x1 decoder channel collapse.

    ref_feat: (B, C, M) bf16 reference features; broadcast over depth
              in-kernel (the D-replicated ref volume never touches HBM).
    src_vols: list of V-1 warped source volumes, each (B, C, D, M) bf16.
    wb:       (C + 1,) f32 -- C decoder weights followed by the bias (SMEM).
    Returns the decoded cost map (B, D, M) in `out_dtype` (bf16).
    """
    Vs = len(src_vols)
    V = Vs + 1
    B, C, D, M = src_vols[0].shape
    inv_v = 1.0 / V

    # Per-lane VMEM bytes: double-buffered bf16 input blocks (with sublane
    # padding), double-buffered output block and the per-channel streaming
    # loop's live f32 temporaries (s, sq, x, var, acc ~ 6 x (D, tl)).
    per_lane = (2 * 2 * (Vs * C * _pad_rows(D, 2) + _pad_rows(C, 2) + _pad_rows(D, 2))
                + 6 * D * 4)
    min_tiles = 1 if B >= 2 else 2
    tl = _pick_tile(M, per_lane, min_tiles=min_tiles)

    def kernel(wb_ref, ref_ref, *refs):
        src_refs, o_ref = refs[:Vs], refs[Vs]
        acc = jnp.zeros(o_ref.shape, jnp.float32)            # (D, tl)
        # Stream per channel: only (D, tl)-sized f32 temporaries stay live.
        for c in range(C):
            r = ref_ref[c:c + 1, :].astype(jnp.float32)      # (1, tl)
            s = r                                            # ref broadcasts over D
            sq = r * r
            for v in range(Vs):
                x = src_refs[v][c].astype(jnp.float32)       # (D, tl)
                s = s + x
                sq = sq + x * x
            mean = s * inv_v
            # clamp cancellation-induced negative variances
            var = jnp.maximum(sq * inv_v - mean * mean, 0.0)
            acc = acc + wb_ref[c] * var                      # decoder collapse
        o_ref[...] = (acc + wb_ref[C]).astype(o_ref.dtype)

    ref_spec = pl.BlockSpec((None, C, tl), lambda b, m: (b, 0, m))
    src_spec = pl.BlockSpec((None, C, D, tl), lambda b, m: (b, 0, 0, m))
    out_spec = pl.BlockSpec((None, D, tl), lambda b, m: (b, 0, m))
    grid = (B, pl.cdiv(M, tl))

    out_bytes = jnp.dtype(out_dtype).itemsize
    bytes_accessed = (Vs * B * C * D * M * 2 + B * C * M * 2
                      + B * D * M * out_bytes + (C + 1) * 4)
    flops = B * D * M * C * (3 * V + 6)

    return pl.pallas_call(
        kernel,
        out_shape=jax.ShapeDtypeStruct((B, D, M), out_dtype),
        grid=grid,
        in_specs=[pl.BlockSpec(memory_space=pltpu.MemorySpace.SMEM),
                  ref_spec] + [src_spec] * Vs,
        out_specs=out_spec,
        compiler_params=pltpu.CompilerParams(
            dimension_semantics=("parallel", "parallel"),
            vmem_limit_bytes=_VMEM_LIMIT),
        cost_estimate=pl.CostEstimate(flops=int(flops), transcendentals=0,
                                      bytes_accessed=int(bytes_accessed)),
    )(wb, ref_feat, *src_vols)


def regression_pallas(cost, drange, with_entropy):
    """Softmax-over-depth + depth regression (+ optional entropy confidence).

    cost:   (B, D, M) bf16/f32 decoded cost map (upcast to f32 in-kernel).
    drange: (B, 2, M) f32 per-pixel (dmin, interval); depth hypothesis k is
            dmin + k*interval, rebuilt in-kernel (no (B, D, M) sample volume).
    Returns depth (B, M) f32 and entropy (B, M) f32 (None if not requested).
    # TODO(synk): exact depth_regression(..., confidence=True) definition is
    # not in the snippet; Shannon entropy of the depth distribution is used.
    """
    B, D, M = cost.shape
    cbytes = jnp.dtype(cost.dtype).itemsize
    n_out = 2 if with_entropy else 1
    per_lane = (2 * _pad_rows(D, cbytes) * cbytes     # double-buffered cost
                + 2 * _pad_rows(2, 4) * 4             # double-buffered drange
                + 2 * n_out * _pad_rows(1, 4) * 4     # double-buffered outputs
                + 6 * D * 4)                          # in-kernel f32 temps
    min_tiles = 1 if B >= 2 else 2
    tm = _pick_tile(M, per_lane, min_tiles=min_tiles)

    def kernel(c_ref, dr_ref, *out_refs):
        depth_ref = out_refs[0]
        c = c_ref[...].astype(jnp.float32)            # (D, tm)
        m = jnp.max(c, axis=0, keepdims=True)
        e = jnp.exp(c - m)
        denom = jnp.sum(e, axis=0, keepdims=True)
        p = e / denom                                 # exact softmax (unbiased)
        k = jax.lax.broadcasted_iota(jnp.int32, c.shape, 0).astype(jnp.float32)
        dv = dr_ref[0:1, :] + k * dr_ref[1:2, :]      # hypotheses rebuilt in-kernel
        depth_ref[...] = jnp.sum(p * dv, axis=0, keepdims=True)
        if with_entropy:
            # analytic entropy: H = log(Z) - sum_i p_i * (c_i - max)
            out_refs[1][...] = jnp.log(denom) - jnp.sum(p * (c - m), axis=0,
                                                        keepdims=True)

    spec_c = pl.BlockSpec((None, D, tm), lambda b, m: (b, 0, m))
    spec_dr = pl.BlockSpec((None, 2, tm), lambda b, m: (b, 0, m))
    spec_o = pl.BlockSpec((None, 1, tm), lambda b, m: (b, 0, m))
    grid = (B, pl.cdiv(M, tm))

    ce = pl.CostEstimate(
        flops=int(B * D * M * 9),
        transcendentals=int(B * M * (D + (1 if with_entropy else 0))),
        bytes_accessed=int(B * M * (D * cbytes + 2 * 4 + n_out * 4)))
    cp = pltpu.CompilerParams(dimension_semantics=("parallel", "parallel"),
                              vmem_limit_bytes=_VMEM_LIMIT)

    if with_entropy:
        depth_o, ent_o = pl.pallas_call(
            kernel,
            out_shape=(jax.ShapeDtypeStruct((B, 1, M), jnp.float32),
                       jax.ShapeDtypeStruct((B, 1, M), jnp.float32)),
            grid=grid, in_specs=[spec_c, spec_dr], out_specs=(spec_o, spec_o),
            compiler_params=cp, cost_estimate=ce,
        )(cost, drange)
        return depth_o[:, 0], ent_o[:, 0]

    depth_o = pl.pallas_call(
        kernel,
        out_shape=jax.ShapeDtypeStruct((B, 1, M), jnp.float32),
        grid=grid, in_specs=[spec_c, spec_dr], out_specs=spec_o,
        compiler_params=cp, cost_estimate=ce,
    )(cost, drange)
    return depth_o[:, 0], None


# ============================ JAX glue ============================

def resize(x, shape, method):
    return jax.image.resize(x, shape, method=method, antialias=False)


def feature_net(img, feat_params, num_stage):
    """Simplified FeatureNet: per-stage avg-pool downsample + 1x1 conv + ReLU.
    # TODO(synk): the real FeatureNet architecture is not in the snippet."""
    B, Cin, H, W = img.shape
    feats = {}
    for s in range(num_stage):
        scale = 4 * (2 ** s)
        Hs, Ws = H // scale, W // scale
        x = img.reshape(B, Cin, Hs, scale, Ws, scale).mean(axis=(3, 5))
        w, b = feat_params[s]                      # w: (C, Cin), b: (C,)
        f = jnp.einsum('oc,bchw->bohw', w, x) + b[None, :, None, None]
        feats[f'stage{s}'] = jnp.maximum(f, 0.0)
    return feats


def get_depth_range_params(cur_depth, ndepth, depth_interval_pixel, shape,
                           max_depth, min_depth):
    """Per-pixel (dmin, interval) maps of shape (B, H, W); depth hypothesis k
    is dmin + k * interval (exactly the get_depth_range_samples sample set)."""
    B, H, W = shape
    if cur_depth.ndim == 2:  # initial (B, D_init) depth hypotheses
        dmin = cur_depth[:, 0]
        dmax = cur_depth[:, -1]
        interval = (dmax - dmin) / (ndepth - 1)
        dmin_map = jnp.broadcast_to(dmin[:, None, None], (B, H, W))
        int_map = jnp.broadcast_to(interval[:, None, None], (B, H, W))
    else:                    # per-pixel depth map (B, H, W)
        dmin_map = jnp.clip(cur_depth - ndepth / 2.0 * depth_interval_pixel,
                            min_depth, None)
        dmax_map = jnp.clip(dmin_map + (ndepth - 1) * depth_interval_pixel,
                            None, max_depth)
        int_map = (dmax_map - dmin_map) / (ndepth - 1)
    return dmin_map.astype(jnp.float32), int_map.astype(jnp.float32)


def bilinear_sample_nchw(fea, x, y):
    """fea: (B, C, H, W); x, y: (B, D, P) pixel coords. Zero padding outside.
    # TODO(synk): data-dependent gather kept in plain JAX; fusing a Pallas
    # DMA-gather with the streaming variance accumulation is the next win."""
    B, C, H, W = fea.shape
    flat = fea.reshape(B, C, H * W)
    x0 = jnp.floor(x)
    y0 = jnp.floor(y)

    def gather(xi, yi, wgt):
        inb = (xi >= 0) & (xi <= W - 1) & (yi >= 0) & (yi <= H - 1)
        xi_c = jnp.clip(xi, 0, W - 1).astype(jnp.int32)
        yi_c = jnp.clip(yi, 0, H - 1).astype(jnp.int32)
        idx = yi_c * W + xi_c                                   # (B, D, P)
        g = jax.vmap(lambda f, i: f[:, i])(flat, idx)           # (B, C, D, P)
        return g * (wgt * inb.astype(fea.dtype))[:, None]

    wx1 = x - x0
    wx0 = 1.0 - wx1
    wy1 = y - y0
    wy0 = 1.0 - wy1
    return (gather(x0, y0, wx0 * wy0) + gather(x0 + 1.0, y0, wx1 * wy0) +
            gather(x0, y0 + 1.0, wx0 * wy1) + gather(x0 + 1.0, y0 + 1.0, wx1 * wy1))


def homo_warping_ms(src_fea, src_proj, ref_proj, depth_values):
    """src_fea: (B, C, H, W), projs: (B, 4, 4), depth_values: (B, D, H, W).
    Returns the warped volume flattened to (B, C, D, H*W)."""
    B, C, H, W = src_fea.shape
    D = depth_values.shape[1]
    proj = jnp.einsum('bij,bjk->bik', src_proj, jnp.linalg.inv(ref_proj))
    rot = proj[:, :3, :3]
    trans = proj[:, :3, 3:4]                                     # (B, 3, 1)

    y, x = jnp.meshgrid(jnp.arange(H, dtype=jnp.float32),
                        jnp.arange(W, dtype=jnp.float32), indexing='ij')
    xyz = jnp.stack([x.ravel(), y.ravel(), jnp.ones(H * W, jnp.float32)], axis=0)
    rot_xyz = jnp.einsum('bij,jk->bik', rot, xyz)                # (B, 3, HW)
    rot_depth_xyz = rot_xyz[:, :, None, :] * depth_values.reshape(B, 1, D, H * W)
    proj_xyz = rot_depth_xyz + trans[:, :, :, None]              # (B, 3, D, HW)
    z = proj_xyz[:, 2]
    z = jnp.where(jnp.abs(z) < 1e-6, 1e-6, z)
    x_src = proj_xyz[:, 0] / z                                   # (B, D, HW)
    y_src = proj_xyz[:, 1] / z
    return bilinear_sample_nchw(src_fea, x_src, y_src)           # (B, C, D, HW)


def get_volume_cost(features, proj_matrices, depth_values, num_depth, dec_w, dec_b):
    """Streams per-view warped bf16 volumes into the fused variance+decoder
    kernel; the reference feature is passed un-broadcast. Returns the decoded
    cost map (B, D, Hs, Ws) in bf16."""
    ref_feature, src_features = features[0], features[1:]
    projs = [proj_matrices[:, v] for v in range(proj_matrices.shape[1])]
    ref_proj, src_projs = projs[0], projs[1:]

    B, C, H, W = ref_feature.shape
    D = num_depth
    M = H * W

    ref_proj_new = ref_proj[:, 0]
    ref_proj_new = ref_proj_new.at[:, :3, :4].set(
        jnp.einsum('bij,bjk->bik', ref_proj[:, 1, :3, :3], ref_proj[:, 0, :3, :4]))

    ref_flat = ref_feature.reshape(B, C, M).astype(jnp.bfloat16)  # no D broadcast
    src_vols = []
    for src_fea, src_proj in zip(src_features, src_projs):
        src_proj_new = src_proj[:, 0]
        src_proj_new = src_proj_new.at[:, :3, :4].set(
            jnp.einsum('bij,bjk->bik', src_proj[:, 1, :3, :3], src_proj[:, 0, :3, :4]))
        warped = homo_warping_ms(src_fea, src_proj_new, ref_proj_new, depth_values)
        src_vols.append(warped.astype(jnp.bfloat16))              # (B, C, D, M)

    wb = jnp.concatenate([dec_w.reshape(-1), dec_b.reshape(-1)]).astype(jnp.float32)
    cost = fused_variance_cost_pallas(ref_flat, src_vols, wb)     # (B, D, M) bf16
    return cost.reshape(B, D, H, W)


def atlas_mvsnet_forward(imgs, proj_matrices, depth_values_init, params):
    ndepths = params['ndepths']
    depth_intervals_ratio = params['depth_intervals_ratio']
    num_stage = len(ndepths)
    output_scaling = params['output_scaling']

    depth_min = float(depth_values_init[0, 0])
    depth_max = float(depth_values_init[0, -1])
    depth_interval = (depth_max - depth_min) / depth_values_init.shape[1]

    B, V, _, H, W = imgs.shape
    output_h, output_w = H // output_scaling, W // output_scaling
    M_out = output_h * output_w

    features = [feature_net(imgs[:, v], params['feat'], num_stage) for v in range(V)]

    depth = None
    entropy = None
    for stage_idx in range(num_stage):
        current_stage = num_stage - (stage_idx + 1)
        features_stage = [f[f'stage{current_stage}'] for f in features]
        proj_stage = proj_matrices[f'stage{current_stage}']
        stage_scale = 4 * (2 ** current_stage)
        Hs, Ws = H // stage_scale, W // stage_scale
        D = ndepths[stage_idx]

        if depth is not None:
            cur_depth = resize(jax.lax.stop_gradient(depth)[:, None],
                               (B, 1, output_h, output_w), 'bilinear')[:, 0]
        else:
            cur_depth = depth_values_init

        dmin_map, dint_map = get_depth_range_params(
            cur_depth, D, depth_intervals_ratio[stage_idx] * depth_interval,
            (B, output_h, output_w), depth_max, depth_min)

        # Depth hypotheses at the stage's feature resolution (for warping).
        # Resizing (dmin, interval) is exactly equivalent to trilinear-resizing
        # the full (B, D, H, W) sample volume because resize is linear.
        dmin_s = resize(dmin_map[:, None], (B, 1, Hs, Ws), 'bilinear')[:, 0]
        dint_s = resize(dint_map[:, None], (B, 1, Hs, Ws), 'bilinear')[:, 0]
        kk = jnp.arange(D, dtype=jnp.float32)[None, :, None, None]
        depth_tmp = dmin_s[:, None] + kk * dint_s[:, None]        # (B, D, Hs, Ws)

        # Pallas: fused view-variance + decoder channel collapse (bf16 out)
        cost = get_volume_cost(features_stage, proj_stage, depth_tmp, D,
                               params['dec_w'][stage_idx],
                               params['dec_b'][stage_idx])        # (B, D, Hs, Ws)
        # bf16 upsample to output resolution (halves the cost round-trip)
        cost = resize(cost, (B, D, output_h, output_w),
                      'bilinear').astype(jnp.bfloat16)

        # Pallas: softmax + regression (+ entropy only on the final stage)
        is_last = stage_idx == num_stage - 1
        drange = jnp.stack([dmin_map.reshape(B, M_out),
                            dint_map.reshape(B, M_out)], axis=1)  # (B, 2, M_out)
        depth_flat, ent_flat = regression_pallas(
            cost.reshape(B, D, M_out), drange, with_entropy=is_last)
        depth = depth_flat.reshape(B, output_h, output_w)
        if is_last:
            entropy = ent_flat.reshape(B, output_h, output_w)

    # inference path of the PyTorch module: return (depth, squeeze(entropy))
    return depth, jnp.squeeze(entropy)


# ============================ setup / main ============================

def build_params(key, num_stage, num_channels, img_channels=3):
    keys = jax.random.split(key, 4 * num_stage)
    feat = []
    dec_w, dec_b = [], []
    for s in range(num_stage):
        w = 0.1 * jax.random.normal(keys[4 * s + 0], (num_channels, img_channels), jnp.float32)
        b = 0.01 * jax.random.normal(keys[4 * s + 1], (num_channels,), jnp.float32)
        feat.append((w, b))
        dw = 0.1 * jax.random.normal(keys[4 * s + 2], (num_channels,), jnp.float32)
        db = 0.01 * jax.random.normal(keys[4 * s + 3], (1,), jnp.float32)
        dec_w.append(dw)
        dec_b.append(db)
    return feat, dec_w, dec_b


def build_proj_matrices(B, V, H, W, num_stage):
    mats = {}
    for s in range(num_stage):
        scale = 4 * (2 ** s)
        Hs, Ws = H // scale, W // scale
        K = jnp.array([[float(Ws), 0.0, Ws / 2.0, 0.0],
                       [0.0, float(Ws), Hs / 2.0, 0.0],
                       [0.0, 0.0, 1.0, 0.0],
                       [0.0, 0.0, 0.0, 1.0]], jnp.float32)
        per_view = []
        for v in range(V):
            E = jnp.eye(4, dtype=jnp.float32).at[0, 3].set(0.1 * v)  # small x-baseline
            per_view.append(jnp.stack([E, K], axis=0))               # (2, 4, 4)
        m = jnp.stack(per_view, axis=0)                              # (V, 2, 4, 4)
        mats[f'stage{s}'] = jnp.broadcast_to(m[None], (B, V, 2, 4, 4)).astype(jnp.float32)
    return mats


if __name__ == "__main__":
    key = jax.random.PRNGKey(0)
    k_img, k_par = jax.random.split(key)

    B, V, H, W = 2, 3, 64, 64
    num_channels = 8
    ndepths = [8, 4, 4, 4]                    # 4-stage configuration
    depth_intervals_ratio = [8, 4, 2, 1]
    num_stage = len(ndepths)

    imgs = jax.random.normal(k_img, (B, V, 3, H, W), jnp.float32)
    proj_matrices = build_proj_matrices(B, V, H, W, num_stage)
    depth_values_init = jnp.broadcast_to(
        jnp.linspace(2.0, 6.0, 16, dtype=jnp.float32)[None], (B, 16))

    feat, dec_w, dec_b = build_params(k_par, num_stage, num_channels)
    params = dict(ndepths=ndepths, depth_intervals_ratio=depth_intervals_ratio,
                  output_scaling=1, feat=feat, dec_w=dec_w, dec_b=dec_b)

    depth, entropy = atlas_mvsnet_forward(imgs, proj_matrices, depth_values_init, params)
    jax.block_until_ready(depth)
    jax.block_until_ready(entropy)
    assert depth.shape == (B, H, W) and entropy.shape == (B, H, W)
    assert bool(jnp.all(jnp.isfinite(depth))) and bool(jnp.all(jnp.isfinite(entropy)))
    print("KERNEL_OK")
</pallas_src>

<mosaic_0001>
module attributes {stable_mosaic.version = 11 : i64} {
  func.func @kernel(%arg0: i32, %arg1: i32, %arg2: memref<9xf32, #tpu.memory_space<smem>>, %arg3: memref<1x8x4xbf16, #tpu.memory_space<vmem>>, %arg4: memref<1x8x8x4xbf16, #tpu.memory_space<vmem>>, %arg5: memref<1x8x8x4xbf16, #tpu.memory_space<vmem>>, %arg6: memref<1x8x4xbf16, #tpu.memory_space<vmem>>) attributes {dimension_semantics = [#tpu.dimension_semantics<parallel>, #tpu.dimension_semantics<parallel>], iteration_bounds = array<i64: 2, 1>, scalar_prefetch = 0 : i64, scratch_operands = 0 : i64, tpu.core_type = #tpu.core_type<tc>, window_params = [{transform_indices = @transform_0, window_bounds = array<i64: 9>}, {transform_indices = @transform_1, window_bounds = array<i64: 1, 8, 4>}, {transform_indices = @transform_2, window_bounds = array<i64: 1, 8, 8, 4>}, {transform_indices = @transform_3, window_bounds = array<i64: 1, 8, 8, 4>}, {transform_indices = @transform_4, window_bounds = array<i64: 1, 8, 4>}]} {
    %cst = arith.constant 0.000000e+00 : f32
    %0 = vector.broadcast %cst : f32 to vector<8x4xf32>
    %c0 = arith.constant 0 : index
    %c0_0 = arith.constant 0 : index
    %c0_1 = arith.constant 0 : index
    %1 = vector.load %arg3[%c0, %c0_0, %c0_1] : memref<1x8x4xbf16, #tpu.memory_space<vmem>>, vector<1x1x4xbf16>
    %2 = vector.shape_cast %1 : vector<1x1x4xbf16> to vector<1x4xbf16>
    %3 = arith.extf %2 : vector<1x4xbf16> to vector<1x4xf32>
    %4 = arith.mulf %3, %3 : vector<1x4xf32>
    %c0_2 = arith.constant 0 : index
    %c0_3 = arith.constant 0 : index
    %c0_4 = arith.constant 0 : index
    %c0_5 = arith.constant 0 : index
    %5 = vector.load %arg4[%c0_2, %c0_3, %c0_4, %c0_5] : memref<1x8x8x4xbf16, #tpu.memory_space<vmem>>, vector<1x1x8x4xbf16>
    %6 = vector.shape_cast %5 : vector<1x1x8x4xbf16> to vector<8x4xbf16>
    %7 = arith.extf %6 : vector<8x4xbf16> to vector<8x4xf32>
    %8 = vector.broadcast %3 : vector<1x4xf32> to vector<8x4xf32>
    %9 = arith.addf %8, %7 : vector<8x4xf32>
    %10 = arith.mulf %7, %7 : vector<8x4xf32>
    %11 = vector.broadcast %4 : vector<1x4xf32> to vector<8x4xf32>
    %12 = arith.addf %11, %10 : vector<8x4xf32>
    %c0_6 = arith.constant 0 : index
    %c0_7 = arith.constant 0 : index
    %c0_8 = arith.constant 0 : index
    %c0_9 = arith.constant 0 : index
    %13 = vector.load %arg5[%c0_6, %c0_7, %c0_8, %c0_9] : memref<1x8x8x4xbf16, #tpu.memory_space<vmem>>, vector<1x1x8x4xbf16>
    %14 = vector.shape_cast %13 : vector<1x1x8x4xbf16> to vector<8x4xbf16>
    %15 = arith.extf %14 : vector<8x4xbf16> to vector<8x4xf32>
    %16 = arith.addf %9, %15 : vector<8x4xf32>
    %17 = arith.mulf %15, %15 : vector<8x4xf32>
    %18 = arith.addf %12, %17 : vector<8x4xf32>
    %cst_10 = arith.constant 0.333333343 : f32
    %19 = vector.broadcast %cst_10 : f32 to vector<8x4xf32>
    %20 = arith.mulf %16, %19 : vector<8x4xf32>
    %cst_11 = arith.constant 0.333333343 : f32
    %21 = vector.broadcast %cst_11 : f32 to vector<8x4xf32>
    %22 = arith.mulf %18, %21 : vector<8x4xf32>
    %23 = arith.mulf %20, %20 : vector<8x4xf32>
    %24 = arith.subf %22, %23 : vector<8x4xf32>
    %cst_12 = arith.constant 0.000000e+00 : f32
    %25 = vector.broadcast %cst_12 : f32 to vector<8x4xf32>
    %26 = arith.maximumf %24, %25 : vector<8x4xf32>
    %c0_13 = arith.constant 0 : index
    %27 = memref.load %arg2[%c0_13] : memref<9xf32, #tpu.memory_space<smem>>
    %28 = vector.broadcast %27 : f32 to vector<8x4xf32>
    %29 = arith.mulf %28, %26 : vector<8x4xf32>
    %30 = arith.addf %0, %29 : vector<8x4xf32>
    %c0_14 = arith.constant 0 : index
    %c1 = arith.constant 1 : index
    %c0_15 = arith.constant 0 : index
    %31 = vector.load %arg3[%c0_14, %c1, %c0_15] : memref<1x8x4xbf16, #tpu.memory_space<vmem>>, vector<1x1x4xbf16>
    %32 = vector.shape_cast %31 : vector<1x1x4xbf16> to vector<1x4xbf16>
    %33 = arith.extf %32 : vector<1x4xbf16> to vector<1x4xf32>
    %34 = arith.mulf %33, %33 : vector<1x4xf32>
    %c0_16 = arith.constant 0 : index
    %c1_17 = arith.constant 1 : index
    %c0_18 = arith.constant 0 : index
    %c0_19 = arith.constant 0 : index
    %35 = vector.load %arg4[%c0_16, %c1_17, %c0_18, %c0_19] : memref<1x8x8x4xbf16, #tpu.memory_space<vmem>>, vector<1x1x8x4xbf16>
    %36 = vector.shape_cast %35 : vector<1x1x8x4xbf16> to vector<8x4xbf16>
    %37 = arith.extf %36 : vector<8x4xbf16> to vector<8x4xf32>
    %38 = vector.broadcast %33 : vector<1x4xf32> to vector<8x4xf32>
    %39 = arith.addf %38, %37 : vector<8x4xf32>
    %40 = arith.mulf %37, %37 : vector<8x4xf32>
    %41 = vector.broadcast %34 : vector<1x4xf32> to vector<8x4xf32>
    %42 = arith.addf %41, %40 : vector<8x4xf32>
    %c0_20 = arith.constant 0 : index
    %c1_21 = arith.constant 1 : index
    %c0_22 = arith.constant 0 : index
    %c0_23 = arith.constant 0 : index
    %43 = vector.load %arg5[%c0_20, %c1_21, %c0_22, %c0_23] : memref<1x8x8x4xbf16, #tpu.memory_space<vmem>>, vector<1x1x8x4xbf16>
    %44 = vector.shape_cast %43 : vector<1x1x8x4xbf16> to vector<8x4xbf16>
    %45 = arith.extf %44 : vector<8x4xbf16> to vector<8x4xf32>
    %46 = arith.addf %39, %45 : vector<8x4xf32>
    %47 = arith.mulf %45, %45 : vector<8x4xf32>
    %48 = arith.addf %42, %47 : vector<8x4xf32>
    %cst_24 = arith.constant 0.333333343 : f32
    %49 = vector.broadcast %cst_24 : f32 to vector<8x4xf32>
    %50 = arith.mulf %46, %49 : vector<8x4xf32>
    %cst_25 = arith.constant 0.333333343 : f32
    %51 = vector.broadcast %cst_25 : f32 to vector<8x4xf32>
    %52 = arith.mulf %48, %51 : vector<8x4xf32>
    %53 = arith.mulf %50, %50 : vector<8x4xf32>
    %54 = arith.subf %52, %53 : vector<8x4xf32>
    %cst_26 = arith.constant 0.000000e+00 : f32
    %55 = vector.broadcast %cst_26 : f32 to vector<8x4xf32>
    %56 = arith.maximumf %54, %55 : vector<8x4xf32>
    %c1_27 = arith.constant 1 : index
    %57 = memref.load %arg2[%c1_27] : memref<9xf32, #tpu.memory_space<smem>>
    %58 = vector.broadcast %57 : f32 to vector<8x4xf32>
    %59 = arith.mulf %58, %56 : vector<8x4xf32>
    %60 = arith.addf %30, %59 : vector<8x4xf32>
    %c0_28 = arith.constant 0 : index
    %c2 = arith.constant 2 : index
    %c0_29 = arith.constant 0 : index
    %61 = vector.load %arg3[%c0_28, %c2, %c0_29] : memref<1x8x4xbf16, #tpu.memory_space<vmem>>, vector<1x1x4xbf16>
    %62 = vector.shape_cast %61 : vector<1x1x4xbf16> to vector<1x4xbf16>
    %63 = arith.extf %62 : vector<1x4xbf16> to vector<1x4xf32>
    %64 = arith.mulf %63, %63 : vector<1x4xf32>
    %c0_30 = arith.constant 0 : index
    %c2_31 = arith.constant 2 : index
    %c0_32 = arith.constant 0 : index
    %c0_33 = arith.constant 0 : index
    %65 = vector.load %arg4[%c0_30, %c2_31, %c0_32, %c0_33] : memref<1x8x8x4xbf16, #tpu.memory_space<vmem>>, vector<1x1x8x4xbf16>
    %66 = vector.shape_cast %65 : vector<1x1x8x4xbf16> to vector<8x4xbf16>
    %67 = arith.extf %66 : vector<8x4xbf16> to vector<8x4xf32>
    %68 = vector.broadcast %63 : vector<1x4xf32> to vector<8x4xf32>
    %69 = arith.addf %68, %67 : vector<8x4xf32>
    %70 = arith.mulf %67, %67 : vector<8x4xf32>
    %71 = vector.broadcast %64 : vector<1x4xf32> to vector<8x4xf32>
    %72 = arith.addf %71, %70 : vector<8x4xf32>
    %c0_34 = arith.constant 0 : index
    %c2_35 = arith.constant 2 : index
    %c0_36 = arith.constant 0 : index
    %c0_37 = arith.constant 0 : index
    %73 = vector.load %arg5[%c0_34, %c2_35, %c0_36, %c0_37] : memref<1x8x8x4xbf16, #tpu.memory_space<vmem>>, vector<1x1x8x4xbf16>
    %74 = vector.shape_cast %73 : vector<1x1x8x4xbf16> to vector<8x4xbf16>
    %75 = arith.extf %74 : vector<8x4xbf16> to vector<8x4xf32>
    %76 = arith.addf %69, %75 : vector<8x4xf32>
    %77 = arith.mulf %75, %75 : vector<8x4xf32>
    %78 = arith.addf %72, %77 : vector<8x4xf32>
    %cst_38 = arith.constant 0.333333343 : f32
    %79 = vector.broadcast %cst_38 : f32 to vector<8x4xf32>
    %80 = arith.mulf %76, %79 : vector<8x4xf32>
    %cst_39 = arith.constant 0.333333343 : f32
    %81 = vector.broadcast %cst_39 : f32 to vector<8x4xf32>
    %82 = arith.mulf %78, %81 : vector<8x4xf32>
    %83 = arith.mulf %80, %80 : vector<8x4xf32>
    %84 = arith.subf %82, %83 : vector<8x4xf32>
    %cst_40 = arith.constant 0.000000e+00 : f32
    %85 = vector.broadcast %cst_40 : f32 to vector<8x4xf32>
    %86 = arith.maximumf %84, %85 : vector<8x4xf32>
    %c2_41 = arith.constant 2 : index
    %87 = memref.load %arg2[%c2_41] : memref<9xf32, #tpu.memory_space<smem>>
    %88 = vector.broadcast %87 : f32 to vector<8x4xf32>
    %89 = arith.mulf %88, %86 : vector<8x4xf32>
    %90 = arith.addf %60, %89 : vector<8x4xf32>
    %c0_42 = arith.constant 0 : index
    %c3 = arith.constant 3 : index
    %c0_43 = arith.constant 0 : index
    %91 = vector.load %arg3[%c0_42, %c3, %c0_43] : memref<1x8x4xbf16, #tpu.memory_space<vmem>>, vector<1x1x4xbf16>
    %92 = vector.shape_cast %91 : vector<1x1x4xbf16> to vector<1x4xbf16>
    %93 = arith.extf %92 : vector<1x4xbf16> to vector<1x4xf32>
    %94 = arith.mulf %93, %93 : vector<1x4xf32>
    %c0_44 = arith.constant 0 : index
    %c3_45 = arith.constant 3 : index
    %c0_46 = arith.constant 0 : index
    %c0_47 = arith.constant 0 : index
    %95 = vector.load %arg4[%c0_44, %c3_45, %c0_46, %c0_47] : memref<1x8x8x4xbf16, #tpu.memory_space<vmem>>, vector<1x1x8x4xbf16>
    %96 = vector.shape_cast %95 : vector<1x1x8x4xbf16> to vector<8x4xbf16>
    %97 = arith.extf %96 : vector<8x4xbf16> to vector<8x4xf32>
    %98 = vector.broadcast %93 : vector<1x4xf32> to vector<8x4xf32>
    %99 = arith.addf %98, %97 : vector<8x4xf32>
    %100 = arith.mulf %97, %97 : vector<8x4xf32>
    %101 = vector.broadcast %94 : vector<1x4xf32> to vector<8x4xf32>
    %102 = arith.addf %101, %100 : vector<8x4xf32>
    %c0_48 = arith.constant 0 : index
    %c3_49 = arith.constant 3 : index
    %c0_50 = arith.constant 0 : index
    %c0_51 = arith.constant 0 : index
    %103 = vector.load %arg5[%c0_48, %c3_49, %c0_50, %c0_51] : memref<1x8x8x4xbf16, #tpu.memory_space<vmem>>, vector<1x1x8x4xbf16>
    %104 = vector.shape_cast %103 : vector<1x1x8x4xbf16> to vector<8x4xbf16>
    %105 = arith.extf %104 : vector<8x4xbf16> to vector<8x4xf32>
    %106 = arith.addf %99, %105 : vector<8x4xf32>
    %107 = arith.mulf %105, %105 : vector<8x4xf32>
    %108 = arith.addf %102, %107 : vector<8x4xf32>
    %cst_52 = arith.constant 0.333333343 : f32
    %109 = vector.broadcast %cst_52 : f32 to vector<8x4xf32>
    %110 = arith.mulf %106, %109 : vector<8x4xf32>
    %cst_53 = arith.constant 0.333333343 : f32
    %111 = vector.broadcast %cst_53 : f32 to vector<8x4xf32>
    %112 = arith.mulf %108, %111 : vector<8x4xf32>
    %113 = arith.mulf %110, %110 : vector<8x4xf32>
    %114 = arith.subf %112, %113 : vector<8x4xf32>
    %cst_54 = arith.constant 0.000000e+00 : f32
    %115 = vector.broadcast %cst_54 : f32 to vector<8x4xf32>
    %116 = arith.maximumf %114, %115 : vector<8x4xf32>
    %c3_55 = arith.constant 3 : index
    %117 = memref.load %arg2[%c3_55] : memref<9xf32, #tpu.memory_space<smem>>
    %118 = vector.broadcast %117 : f32 to vector<8x4xf32>
    %119 = arith.mulf %118, %116 : vector<8x4xf32>
    %120 = arith.addf %90, %119 : vector<8x4xf32>
    %c0_56 = arith.constant 0 : index
    %c4 = arith.constant 4 : index
    %c0_57 = arith.constant 0 : index
    %121 = vector.load %arg3[%c0_56, %c4, %c0_57] : memref<1x8x4xbf16, #tpu.memory_space<vmem>>, vector<1x1x4xbf16>
    %122 = vector.shape_cast %121 : vector<1x1x4xbf16> to vector<1x4xbf16>
    %123 = arith.extf %122 : vector<1x4xbf16> to vector<1x4xf32>
    %124 = arith.mulf %123, %123 : vector<1x4xf32>
    %c0_58 = arith.constant 0 : index
    %c4_59 = arith.constant 4 : index
    %c0_60 = arith.constant 0 : index
    %c0_61 = arith.constant 0 : index
    %125 = vector.load %arg4[%c0_58, %c4_59, %c0_60, %c0_61] : memref<1x8x8x4xbf16, #tpu.memory_space<vmem>>, vector<1x1x8x4xbf16>
    %126 = vector.shape_cast %125 : vector<1x1x8x4xbf16> to vector<8x4xbf16>
    %127 = arith.extf %126 : vector<8x4xbf16> to vector<8x4xf32>
    %128 = vector.broadcast %123 : vector<1x4xf32> to vector<8x4xf32>
    %129 = arith.addf %128, %127 : vector<8x4xf32>
    %130 = arith.mulf %127, %127 : vector<8x4xf32>
    %131 = vector.broadcast %124 : vector<1x4xf32> to vector<8x4xf32>
    %132 = arith.addf %131, %130 : vector<8x4xf32>
    %c0_62 = arith.constant 0 : index
    %c4_63 = arith.constant 4 : index
    %c0_64 = arith.constant 0 : index
    %c0_65 = arith.constant 0 : index
    %133 = vector.load %arg5[%c0_62, %c4_63, %c0_64, %c0_65] : memref<1x8x8x4xbf16, #tpu.memory_space<vmem>>, vector<1x1x8x4xbf16>
    %134 = vector.shape_cast %133 : vector<1x1x8x4xbf16> to vector<8x4xbf16>
    %135 = arith.extf %134 : vector<8x4xbf16> to vector<8x4xf32>
    %136 = arith.addf %129, %135 : vector<8x4xf32>
    %137 = arith.mulf %135, %135 : vector<8x4xf32>
    %138 = arith.addf %132, %137 : vector<8x4xf32>
    %cst_66 = arith.constant 0.333333343 : f32
    %139 = vector.broadcast %cst_66 : f32 to vector<8x4xf32>
    %140 = arith.mulf %136, %139 : vector<8x4xf32>
    %cst_67 = arith.constant 0.333333343 : f32
    %141 = vector.broadcast %cst_67 : f32 to vector<8x4xf32>
    %142 = arith.mulf %138, %141 : vector<8x4xf32>
    %143 = arith.mulf %140, %140 : vector<8x4xf32>
    %144 = arith.subf %142, %143 : vector<8x4xf32>
    %cst_68 = arith.constant 0.000000e+00 : f32
    %145 = vector.broadcast %cst_68 : f32 to vector<8x4xf32>
    %146 = arith.maximumf %144, %145 : vector<8x4xf32>
    %c4_69 = arith.constant 4 : index
    %147 = memref.load %arg2[%c4_69] : memref<9xf32, #tpu.memory_space<smem>>
    %148 = vector.broadcast %147 : f32 to vector<8x4xf32>
    %149 = arith.mulf %148, %146 : vector<8x4xf32>
    %150 = arith.addf %120, %149 : vector<8x4xf32>
    %c0_70 = arith.constant 0 : index
    %c5 = arith.constant 5 : index
    %c0_71 = arith.constant 0 : index
    %151 = vector.load %arg3[%c0_70, %c5, %c0_71] : memref<1x8x4xbf16, #tpu.memory_space<vmem>>, vector<1x1x4xbf16>
    %152 = vector.shape_cast %151 : vector<1x1x4xbf16> to vector<1x4xbf16>
    %153 = arith.extf %152 : vector<1x4xbf16> to vector<1x4xf32>
    %154 = arith.mulf %153, %153 : vector<1x4xf32>
    %c0_72 = arith.constant 0 : index
    %c5_73 = arith.constant 5 : index
    %c0_74 = arith.constant 0 : index
    %c0_75 = arith.constant 0 : index
    %155 = vector.load %arg4[%c0_72, %c5_73, %c0_74, %c0_75] : memref<1x8x8x4xbf16, #tpu.memory_space<vmem>>, vector<1x1x8x4xbf16>
    %156 = vector.shape_cast %155 : vector<1x1x8x4xbf16> to vector<8x4xbf16>
    %157 = arith.extf %156 : vector<8x4xbf16> to vector<8x4xf32>
    %158 = vector.broadcast %153 : vector<1x4xf32> to vector<8x4xf32>
    %159 = arith.addf %158, %157 : vector<8x4xf32>
    %160 = arith.mulf %157, %157 : vector<8x4xf32>
    %161 = vector.broadcast %154 : vector<1x4xf32> to vector<8x4xf32>
    %162 = arith.addf %161, %160 : vector<8x4xf32>
    %c0_76 = arith.constant 0 : index
    %c5_77 = arith.constant 5 : index
    %c0_78 = arith.constant 0 : index
    %c0_79 = arith.constant 0 : index
    %163 = vector.load %arg5[%c0_76, %c5_77, %c0_78, %c0_79] : memref<1x8x8x4xbf16, #tpu.memory_space<vmem>>, vector<1x1x8x4xbf16>
    %164 = vector.shape_cast %163 : vector<1x1x8x4xbf16> to vector<8x4xbf16>
    %165 = arith.extf %164 : vector<8x4xbf16> to vector<8x4xf32>
    %166 = arith.addf %159, %165 : vector<8x4xf32>
    %167 = arith.mulf %165, %165 : vector<8x4xf32>
    %168 = arith.addf %162, %167 : vector<8x4xf32>
    %cst_80 = arith.constant 0.333333343 : f32
    %169 = vector.broadcast %cst_80 : f32 to vector<8x4xf32>
    %170 = arith.mulf %166, %169 : vector<8x4xf32>
    %cst_81 = arith.constant 0.333333343 : f32
    %171 = vector.broadcast %cst_81 : f32 to vector<8x4xf32>
    %172 = arith.mulf %168, %171 : vector<8x4xf32>
    %173 = arith.mulf %170, %170 : vector<8x4xf32>
    %174 = arith.subf %172, %173 : vector<8x4xf32>
    %cst_82 = arith.constant 0.000000e+00 : f32
    %175 = vector.broadcast %cst_82 : f32 to vector<8x4xf32>
    %176 = arith.maximumf %174, %175 : vector<8x4xf32>
    %c5_83 = arith.constant 5 : index
    %177 = memref.load %arg2[%c5_83] : memref<9xf32, #tpu.memory_space<smem>>
    %178 = vector.broadcast %177 : f32 to vector<8x4xf32>
    %179 = arith.mulf %178, %176 : vector<8x4xf32>
    %180 = arith.addf %150, %179 : vector<8x4xf32>
    %c0_84 = arith.constant 0 : index
    %c6 = arith.constant 6 : index
    %c0_85 = arith.constant 0 : index
    %181 = vector.load %arg3[%c0_84, %c6, %c0_85] : memref<1x8x4xbf16, #tpu.memory_space<vmem>>, vector<1x1x4xbf16>
    %182 = vector.shape_cast %181 : vector<1x1x4xbf16> to vector<1x4xbf16>
    %183 = arith.extf %182 : vector<1x4xbf16> to vector<1x4xf32>
    %184 = arith.mulf %183, %183 : vector<1x4xf32>
    %c0_86 = arith.constant 0 : index
    %c6_87 = arith.constant 6 : index
    %c0_88 = arith.constant 0 : index
    %c0_89 = arith.constant 0 : index
    %185 = vector.load %arg4[%c0_86, %c6_87, %c0_88, %c0_89] : memref<1x8x8x4xbf16, #tpu.memory_space<vmem>>, vector<1x1x8x4xbf16>
    %186 = vector.shape_cast %185 : vector<1x1x8x4xbf16> to vector<8x4xbf16>
    %187 = arith.extf %186 : vector<8x4xbf16> to vector<8x4xf32>
    %188 = vector.broadcast %183 : vector<1x4xf32> to vector<8x4xf32>
    %189 = arith.addf %188, %187 : vector<8x4xf32>
    %190 = arith.mulf %187, %187 : vector<8x4xf32>
    %191 = vector.broadcast %184 : vector<1x4xf32> to vector<8x4xf32>
    %192 = arith.addf %191, %190 : vector<8x4xf32>
    %c0_90 = arith.constant 0 : index
    %c6_91 = arith.constant 6 : index
    %c0_92 = arith.constant 0 : index
    %c0_93 = arith.constant 0 : index
    %193 = vector.load %arg5[%c0_90, %c6_91, %c0_92, %c0_93] : memref<1x8x8x4xbf16, #tpu.memory_space<vmem>>, vector<1x1x8x4xbf16>
    %194 = vector.shape_cast %193 : vector<1x1x8x4xbf16> to vector<8x4xbf16>
    %195 = arith.extf %194 : vector<8x4xbf16> to vector<8x4xf32>
    %196 = arith.addf %189, %195 : vector<8x4xf32>
    %197 = arith.mulf %195, %195 : vector<8x4xf32>
    %198 = arith.addf %192, %197 : vector<8x4xf32>
    %cst_94 = arith.constant 0.333333343 : f32
    %199 = vector.broadcast %cst_94 : f32 to vector<8x4xf32>
    %200 = arith.mulf %196, %199 : vector<8x4xf32>
    %cst_95 = arith.constant 0.333333343 : f32
    %201 = vector.broadcast %cst_95 : f32 to vector<8x4xf32>
    %202 = arith.mulf %198, %201 : vector<8x4xf32>
    %203 = arith.mulf %200, %200 : vector<8x4xf32>
    %204 = arith.subf %202, %203 : vector<8x4xf32>
    %cst_96 = arith.constant 0.000000e+00 : f32
    %205 = vector.broadcast %cst_96 : f32 to vector<8x4xf32>
    %206 = arith.maximumf %204, %205 : vector<8x4xf32>
    %c6_97 = arith.constant 6 : index
    %207 = memref.load %arg2[%c6_97] : memref<9xf32, #tpu.memory_space<smem>>
    %208 = vector.broadcast %207 : f32 to vector<8x4xf32>
    %209 = arith.mulf %208, %206 : vector<8x4xf32>
    %210 = arith.addf %180, %209 : vector<8x4xf32>
    %c0_98 = arith.constant 0 : index
    %c7 = arith.constant 7 : index
    %c0_99 = arith.constant 0 : index
    %211 = vector.load %arg3[%c0_98, %c7, %c0_99] : memref<1x8x4xbf16, #tpu.memory_space<vmem>>, vector<1x1x4xbf16>
    %212 = vector.shape_cast %211 : vector<1x1x4xbf16> to vector<1x4xbf16>
    %213 = arith.extf %212 : vector<1x4xbf16> to vector<1x4xf32>
    %214 = arith.mulf %213, %213 : vector<1x4xf32>
    %c0_100 = arith.constant 0 : index
    %c7_101 = arith.constant 7 : index
    %c0_102 = arith.constant 0 : index
    %c0_103 = arith.constant 0 : index
    %215 = vector.load %arg4[%c0_100, %c7_101, %c0_102, %c0_103] : memref<1x8x8x4xbf16, #tpu.memory_space<vmem>>, vector<1x1x8x4xbf16>
    %216 = vector.shape_cast %215 : vector<1x1x8x4xbf16> to vector<8x4xbf16>
    %217 = arith.extf %216 : vector<8x4xbf16> to vector<8x4xf32>
    %218 = vector.broadcast %213 : vector<1x4xf32> to vector<8x4xf32>
    %219 = arith.addf %218, %217 : vector<8x4xf32>
    %220 = arith.mulf %217, %217 : vector<8x4xf32>
    %221 = vector.broadcast %214 : vector<1x4xf32> to vector<8x4xf32>
    %222 = arith.addf %221, %220 : vector<8x4xf32>
    %c0_104 = arith.constant 0 : index
    %c7_105 = arith.constant 7 : index
    %c0_106 = arith.constant 0 : index
    %c0_107 = arith.constant 0 : index
    %223 = vector.load %arg5[%c0_104, %c7_105, %c0_106, %c0_107] : memref<1x8x8x4xbf16, #tpu.memory_space<vmem>>, vector<1x1x8x4xbf16>
    %224 = vector.shape_cast %223 : vector<1x1x8x4xbf16> to vector<8x4xbf16>
    %225 = arith.extf %224 : vector<8x4xbf16> to vector<8x4xf32>
    %226 = arith.addf %219, %225 : vector<8x4xf32>
    %227 = arith.mulf %225, %225 : vector<8x4xf32>
    %228 = arith.addf %222, %227 : vector<8x4xf32>
    %cst_108 = arith.constant 0.333333343 : f32
    %229 = vector.broadcast %cst_108 : f32 to vector<8x4xf32>
    %230 = arith.mulf %226, %229 : vector<8x4xf32>
    %cst_109 = arith.constant 0.333333343 : f32
    %231 = vector.broadcast %cst_109 : f32 to vector<8x4xf32>
    %232 = arith.mulf %228, %231 : vector<8x4xf32>
    %233 = arith.mulf %230, %230 : vector<8x4xf32>
    %234 = arith.subf %232, %233 : vector<8x4xf32>
    %cst_110 = arith.constant 0.000000e+00 : f32
    %235 = vector.broadcast %cst_110 : f32 to vector<8x4xf32>
    %236 = arith.maximumf %234, %235 : vector<8x4xf32>
    %c7_111 = arith.constant 7 : index
    %237 = memref.load %arg2[%c7_111] : memref<9xf32, #tpu.memory_space<smem>>
    %238 = vector.broadcast %237 : f32 to vector<8x4xf32>
    %239 = arith.mulf %238, %236 : vector<8x4xf32>
    %240 = arith.addf %210, %239 : vector<8x4xf32>
    %c8 = arith.constant 8 : index
    %241 = memref.load %arg2[%c8] : memref<9xf32, #tpu.memory_space<smem>>
    %242 = vector.broadcast %241 : f32 to vector<8x4xf32>
    %243 = arith.addf %240, %242 : vector<8x4xf32>
    %244 = arith.truncf %243 : vector<8x4xf32> to vector<8x4xbf16>
    %c0_112 = arith.constant 0 : index
    %c0_113 = arith.constant 0 : index
    %c0_114 = arith.constant 0 : index
    %245 = vector.load %arg6[%c0_112, %c0_113, %c0_114] : memref<1x8x4xbf16, #tpu.memory_space<vmem>>, vector<1x8x4xbf16>
    %246 = vector.shape_cast %245 : vector<1x8x4xbf16> to vector<8x4xbf16>
    %247 = vector.shape_cast %244 : vector<8x4xbf16> to vector<1x8x4xbf16>
    tpu.vector_store %arg6[%c0_112, %c0_113, %c0_114], %247 {strides = array<i32>} : memref<1x8x4xbf16, #tpu.memory_space<vmem>>, vector<1x8x4xbf16>,
    return
  }
  func.func @transform_0(%arg0: i32, %arg1: i32) -> i32 {
    %c0_i32 = arith.constant 0 : i32
    %c0_i32_0 = arith.constant 0 : i32
    return %c0_i32 : i32
  }
  func.func @transform_1(%arg0: i32, %arg1: i32) -> (i32, i32, i32) {
    %c0_i32 = arith.constant 0 : i32
    %c0_i32_0 = arith.constant 0 : i32
    return %arg0, %c0_i32, %arg1 : i32, i32, i32
  }
  func.func @transform_2(%arg0: i32, %arg1: i32) -> (i32, i32, i32, i32) {
    %c0_i32 = arith.constant 0 : i32
    %c0_i32_0 = arith.constant 0 : i32
    %c0_i32_1 = arith.constant 0 : i32
    return %arg0, %c0_i32, %c0_i32_0, %arg1 : i32, i32, i32, i32
  }
  func.func @transform_3(%arg0: i32, %arg1: i32) -> (i32, i32, i32, i32) {
    %c0_i32 = arith.constant 0 : i32
    %c0_i32_0 = arith.constant 0 : i32
    %c0_i32_1 = arith.constant 0 : i32
    return %arg0, %c0_i32, %c0_i32_0, %arg1 : i32, i32, i32, i32
  }
  func.func @transform_4(%arg0: i32, %arg1: i32) -> (i32, i32, i32) {
    %c0_i32 = arith.constant 0 : i32
    %c0_i32_0 = arith.constant 0 : i32
    return %arg0, %c0_i32, %arg1 : i32, i32, i32
  }
}

</mosaic_0001>

<bundles_post_ra>
// kernel: tpu_custom_call.1
= control target key start
LH: loop header
LB: loop body
LE: loop exit
PB: predicated region body
PF: predicated region fallthrough
CT: control target
= control target key end

     0   :  { %9 = vsyncpa [#allocation3], 0  ;;  %s766_s15 = smov 0   ;;  %s768_s16 = smov 0   ;;  %s858_s0 = inlined_call_operand.vmem [shape: f32[9], index: 0, kind: input, shape index: {}]   ;;  %s859_s1 = inlined_call_operand.vmem [shape: bf16[2,8,4], index: 1, kind: input, shape index: {}]   ;;  %s860_s2 = inlined_call_operand.vmem [shape: bf16[2,8,8,4], index: 2, kind: input, shape index: {}]   ;;  %s861_s3 = inlined_call_operand.vmem [shape: bf16[2,8,8,4], index: 3, kind: input, shape index: {}]   ;;  %s862_s4 = inlined_call_operand.vmem [shape: bf16[2,8,4], index: 4, kind: output, shape index: {}]  }
   0x1   :  { %s770_s17 = smov 0  }
   0x2 LB: > { %s623_s18 = sadd.s32 4294967295, %s738_s17   ;;  %s27_s19 = sadd.s32 1, %s734_s16  ;;  %s738_s17 = sphi %s770_s17, %s15_s17   ;;  %s734_s16 = sphi %s768_s16, %s864_s16   ;;  %s730_s15 = sphi %s766_s15, %s863_s15  }
   0x3   : > { %p29_p0 = scmp.ge.s32.totalorder %s27_s19, 2  ;;  %p625_p1 = scmp.ge.s32.totalorder %s738_s17, 1 }
   0x4   : > { %p165_p2 = scmp.lt.s32.totalorder %s738_s17, 3  ;;  %p670_p4 = scmp.eq.s32.totalorder %s623_s18, 0 }
   0x5   : > { %s866_s19 = smov (%p29_p0, %s27_s19), 0  ;;  %s177_s22 = sshll.u32 %s858_s0, 4  ;;  %s178_s22 = int_to_ptr.vmem [resolvable:$true] %s177_s22 }
   0x6   : > { %p166_p3 = pnand %p625_p1, %p165_p2  ;;  %s740_s23 = smov [#allocation2]  }
   0x8   : > { %p666_p5 = pneg %p166_p3  ;;  %222 = sbr.rel (%p166_p3) target bundleno = 74 (0x4a), region = 36 }
   0xa   : > { %p667_p6 = pnand %p670_p4, %p666_p5 }
   0xc   : > { %669 = dma.vmem_to_smem (!%p667_p6), %s178_s22, 16, %s740_s23, [#allocation3]  }
   0xd   : > { %725 = dma.done.wait (%p670_p4), [#allocation3], 16  }
   0xe   : > { %727 = vsyncadd (%p670_p4), [#allocation3], 4294967280 }
   0xf   : > { %229 = sfence }
  0x10   : > { %p270_p7 = scmp.lt.s32.totalorder %s730_s15, 1  ;;  %s788_s24 = sld [smem:[#allocation2]]  ;;  %vm498_vm0 = vcmask 27648  }
  0x11   : > { %s792_s25 = sld [smem:[#allocation2 + $0x1]] }
  0x12   : > { %s868_s15 = smov (!%p270_p7, %s730_s15), 1  ;;  %s820_s11 = sld [smem:[#allocation2 + $0x2]] }
  0x13   : > { %s630_s26 = sshll.u32 %s868_s15, 2  ;;  %s660_s27 = sshll.u32 %s868_s15, 5 }
  0x14   : > { %s801_s30 = scalar_lea.vmem %s859_s1, %s630_s26  ;;  %s806_s7 = scalar_lea.vmem %s860_s2, %s660_s27 }
  0x15   : > { %s811_s10 = scalar_lea.vmem %s861_s3, %s660_s27  ;;  %v300_v0 = vld [vmem:[%s801_s30] sm:$0x1]  ;;  %v347_v2 = vld [vmem:[%s801_s30] sm:$0x2]  ;;  %v639_v8 = vld [vmem:[%s806_s7 + $0x8] sm:$0xff]   ;;  %s823_s12 = sld [smem:[#allocation2 + $0x3]] }
  0x16   : > { %v303_v1 = vld [vmem:[%s806_s7] sm:$0xff]   ;;  %v301_v3 = vunpack.c.l.bf16 %v300_v0  ;;  %v321_v6 = vstv %s788_s24  ;;  %v348_v11 = vunpack.c.l.bf16 %v347_v2  ;;  %v352_v12 = vunpack.c.l.bf16 %v639_v8  ;;  %v640_v17 = vld [vmem:[%s811_s10 + $0x8] sm:$0xff]   ;;  %v645_v51 = vld [vmem:[%s806_s7 + $0x10] sm:$0xff]   ;;  %s828_s13 = sld [smem:[#allocation2 + $0x4]]  ;;  %s299_s24 = scalar_lea.vmem %s862_s4, %s630_s26 }
  0x17   : > { %v304_v4 = vunpack.c.l.bf16 %v303_v1  ;;  %v310_v5 = vld [vmem:[%s811_s10] sm:$0xff]   ;;  %v326_v7 = vunpack.c.h.bf16 %v303_v1  ;;  %v360_v29 = vunpack.c.l.bf16 %v640_v17  ;;  %v344_v34 = vstv %s792_s25  ;;  %s834_s14 = sld [smem:[#allocation2 + $0x5]] }
  0x18   : > { %v311_v9 = vunpack.c.l.bf16 %v310_v5  ;;  %v334_v10 = vunpack.c.h.bf16 %v310_v5  ;;  %v302_v13 = vmul.f32 %v301_v3, %v301_v3  ;;  %v305_v14 = vperm.slane %v301_v3, 0  ;;  %v396_v46 = vld [vmem:[%s801_s30] sm:$0x4]  ;;  %s841_s18 = sld [smem:[#allocation2 + $0x6]] }
  0x19   : > { %v307_v15 = vmul.f32 %v304_v4, %v304_v4  ;;  %v327_v16 = vperm.slane %v301_v3, 1  ;;  %v329_v19 = vmul.f32 %v326_v7, %v326_v7  ;;  %v349_v21 = vmul.f32 %v348_v11, %v348_v11  ;;  %s656_s20 = sld [smem:[#allocation2 + $0x7]] }
  0x1a   : > { %v313_v18 = vmul.f32 %v311_v9, %v311_v9  ;;  %v336_v20 = vmul.f32 %v334_v10, %v334_v10  ;;  %v306_v22 = vadd.f32 %v305_v14, %v304_v4  ;;  %v308_v23 = vperm.slane %v302_v13, 0  ;;  %s657_s21 = sld [smem:[#allocation2 + $0x8]] }
  0x1b   : > { %v328_v24 = vadd.f32 %v327_v16, %v326_v7  ;;  %v330_v25 = vperm.slane %v302_v13, 1  ;;  %v353_v26 = vperm.slane %v348_v11, 2  ;;  %v355_v27 = vmul.f32 %v352_v12, %v352_v12 }
  0x1c   : > { %v356_v28 = vperm.slane %v349_v21, 2  ;;  %v309_v30 = vadd.f32 %v308_v23, %v307_v15  ;;  %v312_v31 = vadd.f32 %v311_v9, %v306_v22  ;;  %v362_v37 = vmul.f32 %v360_v29, %v360_v29  ;;  %v646_v9 = vld [vmem:[%s811_s10 + $0x10] sm:$0xff]  }
  0x1d   : > { %v331_v32 = vadd.f32 %v330_v25, %v329_v19  ;;  %v335_v33 = vadd.f32 %v334_v10, %v328_v24  ;;  %v354_v35 = vadd.f32 %v353_v26, %v352_v12  ;;  %v375_v44 = vunpack.c.h.bf16 %v639_v8 }
  0x1e   : > { %v357_v36 = vadd.f32 %v356_v28, %v355_v27  ;;  %v314_v38 = vadd.f32 %v313_v18, %v309_v30  ;;  %v315_v39 = vmul.f32 0.33333334, %v312_v31  ;;  %v376_v45 = vperm.slane %v348_v11, 3 }
  0x1f   : > { %v337_v40 = vadd.f32 %v336_v20, %v331_v32  ;;  %v338_v41 = vmul.f32 0.33333334, %v335_v33  ;;  %v361_v42 = vadd.f32 %v360_v29, %v354_v35  ;;  %v378_v55 = vmul.f32 %v375_v44, %v375_v44  ;;  %v445_v29 = vld [vmem:[%s801_s30] sm:$0x8] }
  0x20   : > { %v363_v43 = vadd.f32 %v362_v37, %v357_v36  ;;  %v316_v47 = vmul.f32 0.33333334, %v314_v38  ;;  %v317_v48 = vmul.f32 %v315_v39, %v315_v39  ;;  %v377_v54 = vadd.f32 %v376_v45, %v375_v44 }
  0x21   : > { %v339_v49 = vmul.f32 0.33333334, %v337_v40  ;;  %v340_v50 = vmul.f32 %v338_v41, %v338_v41  ;;  %v364_v52 = vmul.f32 0.33333334, %v361_v42  ;;  %v379_v58 = vperm.slane %v349_v21, 3 }
  0x22   : > { %v365_v53 = vmul.f32 0.33333334, %v363_v43  ;;  %v318_v56 = vsub.f32 %v316_v47, %v317_v48  ;;  %v383_v59 = vunpack.c.h.bf16 %v640_v17  ;;  %v370_v61 = vstv %s820_s11  ;;  %v652_v43 = vld [vmem:[%s811_s10 + $0x18] sm:$0xff]  }
  0x23   : > { %v341_v57 = vsub.f32 %v339_v49, %v340_v50  ;;  %v366_v60 = vmul.f32 %v364_v52, %v364_v52  ;;  %v397_v62 = vunpack.c.l.bf16 %v396_v46  ;;  %v401_v63 = vunpack.c.l.bf16 %v645_v51 }
  0x24   : > { %v319_v0 = vmax.f32 %v318_v56, 0.0  ;;  %v380_v2 = vadd.f32 %v379_v58, %v378_v55  ;;  %v384_v3 = vadd.f32 %v383_v59, %v377_v54  ;;  %v385_v5 = vmul.f32 %v383_v59, %v383_v59 }
  0x25   : > { %v342_v1 = vmax.f32 %v341_v57, 0.0  ;;  %v367_v4 = vsub.f32 %v365_v53, %v366_v60  ;;  %v398_v7 = vmul.f32 %v397_v62, %v397_v62  ;;  %v402_v8 = vperm.slane %v397_v62, 4 }
  0x26   : > { %v322_v10 = vmul.f32 %v321_v6, %v319_v0  ;;  %v387_v12 = vmul.f32 0.33333334, %v384_v3  ;;  %v404_v13 = vmul.f32 %v401_v63, %v401_v63  ;;  %v386_v15 = vadd.f32 %v385_v5, %v380_v2 }
  0x27   : > { %v345_v11 = vmul.f32 %v344_v34, %v342_v1  ;;  %v368_v14 = vmax.f32 %v367_v4, 0.0  ;;  %v403_v16 = vadd.f32 %v402_v8, %v401_v63  ;;  %v405_v17 = vperm.slane %v398_v7, 4  ;;  %v651_v34 = vld [vmem:[%s806_s7 + $0x18] sm:$0xff]  }
  0x28   : > { %v389_v19 = vmul.f32 %v387_v12, %v387_v12  ;;  %v393_v20 = vstv %s823_s12  ;;  %v409_v21 = vunpack.c.l.bf16 %v646_v9  ;;  %v388_v23 = vmul.f32 0.33333334, %v386_v15 }
  0x29   : > { %v346_v18 = vadd.f32 %v345_v11, %v322_v10  ;;  %v371_v22 = vmul.f32 %v370_v61, %v368_v14  ;;  %v406_v24 = vadd.f32 %v405_v17, %v404_v13  ;;  %v424_v25 = vunpack.c.h.bf16 %v645_v51 }
  0x2a   : > { %v410_v6 = vadd.f32 %v409_v21, %v403_v16  ;;  %v411_v26 = vmul.f32 %v409_v21, %v409_v21  ;;  %v425_v27 = vperm.slane %v397_v62, 5  ;;  %v428_v28 = vperm.slane %v398_v7, 5 }
  0x2b   : > { %v390_v30 = vsub.f32 %v388_v23, %v389_v19  ;;  %v419_v31 = vstv %s828_s13  ;;  %v427_v32 = vmul.f32 %v424_v25, %v424_v25  ;;  %v432_v33 = vunpack.c.h.bf16 %v646_v9 }
  0x2c   : > { %v372_v35 = vadd.f32 %v371_v22, %v346_v18  ;;  %v412_v36 = vadd.f32 %v411_v26, %v406_v24  ;;  %v413_v37 = vmul.f32 0.33333334, %v410_v6  ;;  %v426_v38 = vadd.f32 %v425_v27, %v424_v25 }
  0x2d   : > { %v391_v39 = vmax.f32 %v390_v30, 0.0  ;;  %v429_v40 = vadd.f32 %v428_v28, %v427_v32  ;;  %v434_v41 = vmul.f32 %v432_v33, %v432_v33  ;;  %v446_v42 = vunpack.c.l.bf16 %v445_v29 }
  0x2e   : > { %v414_v44 = vmul.f32 0.33333334, %v412_v36  ;;  %v415_v45 = vmul.f32 %v413_v37, %v413_v37  ;;  %v433_v46 = vadd.f32 %v432_v33, %v426_v38  ;;  %v450_v47 = vunpack.c.l.bf16 %v651_v34 }
  0x2f   : > { %v394_v48 = vmul.f32 %v393_v20, %v391_v39  ;;  %v435_v49 = vadd.f32 %v434_v41, %v429_v40  ;;  %v447_v50 = vmul.f32 %v446_v42, %v446_v42  ;;  %v451_v51 = vperm.slane %v446_v42, 6 }
  0x30   : > { %v416_v52 = vsub.f32 %v414_v44, %v415_v45  ;;  %v436_v53 = vmul.f32 0.33333334, %v433_v46  ;;  %v453_v54 = vmul.f32 %v450_v47, %v450_v47  ;;  %v458_v55 = vunpack.c.l.bf16 %v652_v43 }
  0x31   : > { %v437_v56 = vmul.f32 0.33333334, %v435_v49  ;;  %v442_v57 = vstv %s834_s14  ;;  %v452_v58 = vadd.f32 %v451_v51, %v450_v47  ;;  %v454_v59 = vperm.slane %v447_v50, 6 }
  0x32   : > { %v395_v60 = vadd.f32 %v394_v48, %v372_v35  ;;  %v417_v61 = vmax.f32 %v416_v52, 0.0  ;;  %v438_v62 = vmul.f32 %v436_v53, %v436_v53  ;;  %v460_v63 = vmul.f32 %v458_v55, %v458_v55 }
  0x33   : > { %v455_v0 = vadd.f32 %v454_v59, %v453_v54  ;;  %v459_v1 = vadd.f32 %v458_v55, %v452_v58  ;;  %v473_v2 = vunpack.c.h.bf16 %v651_v34  ;;  %v474_v3 = vperm.slane %v446_v42, 7 }
  0x34   : > { %v420_v4 = vmul.f32 %v419_v31, %v417_v61  ;;  %v439_v5 = vsub.f32 %v437_v56, %v438_v62  ;;  %v477_v7 = vperm.slane %v447_v50, 7  ;;  %v481_v8 = vunpack.c.h.bf16 %v652_v43 }
  0x35   : > { %v461_v9 = vadd.f32 %v460_v63, %v455_v0  ;;  %v462_v10 = vmul.f32 0.33333334, %v459_v1  ;;  %v475_v11 = vadd.f32 %v474_v3, %v473_v2  ;;  %v476_v12 = vmul.f32 %v473_v2, %v473_v2 }
  0x36   : > { %v421_v13 = vadd.f32 %v420_v4, %v395_v60  ;;  %v440_v14 = vmax.f32 %v439_v5, 0.0  ;;  %v483_v15 = vmul.f32 %v481_v8, %v481_v8  ;;  %v468_v24 = vstv %s841_s18 }
  0x37   : > { %v463_v16 = vmul.f32 0.33333334, %v461_v9  ;;  %v464_v17 = vmul.f32 %v462_v10, %v462_v10  ;;  %v478_v18 = vadd.f32 %v477_v7, %v476_v12  ;;  %v482_v19 = vadd.f32 %v481_v8, %v475_v11 }
  0x38   : > { %v443_v20 = vmul.f32 %v442_v57, %v440_v14  ;;  %v491_v30 = vstv %s656_s20  ;;  %v495_v34 = vstv %s657_s21 }
  0x39   : > { %v465_v21 = vsub.f32 %v463_v16, %v464_v17  ;;  %v484_v22 = vadd.f32 %v483_v15, %v478_v18  ;;  %v485_v23 = vmul.f32 0.33333334, %v482_v19 }
  0x3a   : > { %v444_v25 = vadd.f32 %v443_v20, %v421_v13 }
  0x3b   : > { %v466_v6 = vmax.f32 %v465_v21, 0.0  ;;  %v486_v26 = vmul.f32 0.33333334, %v484_v22  ;;  %v487_v27 = vmul.f32 %v485_v23, %v485_v23 }
  0x3d   : > { %v469_v28 = vmul.f32 %v468_v24, %v466_v6  ;;  %v488_v29 = vsub.f32 %v486_v26, %v487_v27 }
  0x3f   : > { %v470_v31 = vadd.f32 %v469_v28, %v444_v25  ;;  %v489_v32 = vmax.f32 %v488_v29, 0.0 }
  0x41   : > { %v492_v33 = vmul.f32 %v491_v30, %v489_v32 }
  0x43   : > { %v493_v35 = vadd.f32 %v492_v33, %v470_v31 }
  0x45   : > { %v496_v36 = vadd.f32 %v495_v34, %v493_v35 }
  0x47   : > { %v497_v37 = vpack.c.bf16 %v496_v36, %v496_v36 }
  0x49   : > { %499 = vst.msk [vmem:[%s299_s24] sm:$0xf] %vm498_vm0, %v497_v37 }
  0x4a PF: > { %s15_s17 = sadd.s32 1, %s738_s17   ;;  %s863_s15 = smov %s734_s16 }
  0x4b   : > { %p12_p8 = scmp.ge.s32.totalorder %s15_s17, 4   ;;  %s864_s16 = smov %s866_s19 }
  0x4d   :  { %14 = sbr.rel (!%p12_p8) target bundleno = 2 (0x2), region = 91 }
  0x52   :  { %525 = vsyncpa [#allocation3], 1 }
  0x53   :  { %527 = vsyncpa [#allocation3 + $0x1], 1 }

</bundles_post_ra>
